<compile_context>
chip_gen: v7x
topology: tpu7x:2x2x1
jax: 0.10.0
libtpu: 0.0.40
codegen_flags: <defaults>
</compile_context>

<pallas_src>
import functools
import math

import jax
import jax.numpy as jnp
from jax.experimental import pallas as pl
from jax.experimental.pallas import tpu as pltpu

_LANE = 128          # lane width
_BLOCK_ROWS = 512    # rows per grid step: 512*128*4B = 256 KiB per f32 block


def _i32(v):
    """uint32 constant -> Python int with the same int32 two's-complement value."""
    v &= 0xFFFFFFFF
    return v - (1 << 32) if v >= (1 << 31) else v


_M1 = _i32(0x85EBCA6B)    # murmur3 fmix32 constants
_M2 = _i32(0xC2B2AE35)
_GOLD = _i32(0x9E3779B9)  # golden-ratio Weyl increment
_S1 = _i32(0x68E31DA4)    # stream salt for the cos half
_S2 = _i32(0xB5297A4D)    # stream salt for the sin half

_TWO_PI = 2.0 * math.pi
_INV_2_24 = 1.0 / float(1 << 24)


def _srl(x, k):
    """Logical right shift of int32 by a static k (arithmetic shift + mask)."""
    return (x >> k) & ((1 << (32 - k)) - 1)


def _fmix32(x):
    """murmur3 finalizer: avalanche mix of int32 values (wrapping arithmetic)."""
    x = x ^ _srl(x, 16)
    x = x * _M1
    x = x ^ _srl(x, 13)
    x = x * _M2
    x = x ^ _srl(x, 16)
    return x


def _cos_2pi(x):
    """cos(2*pi*x) for x in [-0.5, 0.5] via a degree-14 Taylor polynomial."""
    t = _TWO_PI * x
    z = t * t
    c = -1.0 / 87178291200.0
    c = c * z + 1.0 / 479001600.0
    c = c * z + -1.0 / 3628800.0
    c = c * z + 1.0 / 40320.0
    c = c * z + -1.0 / 720.0
    c = c * z + 1.0 / 24.0
    c = c * z + -0.5
    c = c * z + 1.0
    return c


def _noise_kernel(seed_ref, x_ref, o_ref, *, amp):
    rows, lane = x_ref.shape
    half = (rows + 1) // 2
    rest = rows - half

    # One counter drives a pair of outputs: row r of the top half (cos branch)
    # and row r of the bottom half (sin branch). Counters are globally unique
    # per (seed, block, position) -> grid steps are independent.
    r_idx = jax.lax.broadcasted_iota(jnp.int32, (half, lane), 0)
    c_idx = jax.lax.broadcasted_iota(jnp.int32, (half, lane), 1)
    ctr = pl.program_id(0) * (half * lane) + r_idx * lane + c_idx

    seed = seed_ref[0]
    base = ctr * _GOLD + seed          # Weyl pre-mix (wraps mod 2^32)
    bits1 = _fmix32(base ^ _S1)
    bits2 = _fmix32(base ^ _S2)

    # 24-bit uniforms: u1 in (0, 1] keeps log() finite, u2 in [0, 1).
    u1 = (_srl(bits1, 8).astype(jnp.float32) + 1.0) * _INV_2_24
    u2 = _srl(bits2, 8).astype(jnp.float32) * _INV_2_24

    # Box-Muller, using BOTH outputs: z0 = r*cos(theta), z1 = r*sin(theta).
    rad = jnp.sqrt(-2.0 * jnp.log(u1))
    xc = jnp.where(u2 >= 0.5, u2 - 1.0, u2)       # cos arg in [-0.5, 0.5)
    xs = u2 - 0.25                                 # sin(2*pi*u) = cos(2*pi*(u-1/4))
    xs = jnp.where(xs >= 0.5, xs - 1.0, xs)
    z0 = rad * _cos_2pi(xc)
    z1 = rad * _cos_2pi(xs)

    out_dtype = o_ref.dtype
    x_top = x_ref[:half, :].astype(jnp.float32)
    o_ref[:half, :] = (x_top + z0 * amp).astype(out_dtype)
    if rest:
        x_bot = x_ref[half:, :].astype(jnp.float32)
        o_ref[half:, :] = (x_bot + z1[:rest, :] * amp).astype(out_dtype)


def additive_gaussian_noise(x, amp, seed=0):
    """out = x + N(0, 1) * amp, elementwise (Pallas TPU kernel).

    `amp` must be a static Python scalar (it is baked into the kernel).
    """
    orig_shape = x.shape
    flat = x.reshape(-1)
    n = flat.shape[0]

    # Lane-dense (rows, 128) view; only pad the ragged tail (< 128 elements).
    pad = (-n) % _LANE
    if pad:
        flat = jnp.pad(flat, (0, pad))
    rows = flat.shape[0] // _LANE
    x2d = flat.reshape(rows, _LANE)

    block_rows = _BLOCK_ROWS if rows >= _BLOCK_ROWS else rows
    grid = (pl.cdiv(rows, block_rows),)

    seed_arr = jnp.array([seed], dtype=jnp.int32)

    out2d = pl.pallas_call(
        functools.partial(_noise_kernel, amp=float(amp)),
        out_shape=jax.ShapeDtypeStruct((rows, _LANE), x.dtype),
        grid_spec=pltpu.PrefetchScalarGridSpec(
            num_scalar_prefetch=1,
            grid=grid,
            in_specs=[pl.BlockSpec((block_rows, _LANE), lambda i, sref: (i, 0))],
            out_specs=pl.BlockSpec((block_rows, _LANE), lambda i, sref: (i, 0)),
        ),
        compiler_params=pltpu.CompilerParams(
            # Noise depends only on (seed, program_id, position): grid steps
            # are independent, so let multi-TC parts shard the grid.
            dimension_semantics=("parallel",),
        ),
    )(seed_arr, x2d)

    out = out2d.reshape(-1)
    if pad:
        out = out[:n]
    return out.reshape(orig_shape)


if __name__ == "__main__":
    key = jax.random.PRNGKey(0)
    x = jax.random.normal(key, (2, 4, 16, 16), dtype=jnp.float32)  # NCHW
    amp = 0.1

    y = additive_gaussian_noise(x, amp, seed=1234)
    y = jax.block_until_ready(y)

    # Sanity: shape/dtype preserved; noise ~ N(0, amp^2), finite and bounded.
    assert y.shape == x.shape and y.dtype == x.dtype
    diff = y - x
    assert bool(jnp.all(jnp.isfinite(diff)))
    std = float(jnp.std(diff))
    mean = float(jnp.mean(diff))
    assert 0.05 < std < 0.2, std
    assert abs(mean) < 0.05, mean
    assert float(jnp.max(jnp.abs(diff))) < 10.0 * amp

    print("KERNEL_OK")
</pallas_src>

<mosaic_0001>
module attributes {stable_mosaic.version = 11 : i64} {
  func.func @_noise_kernel(%arg0: i32, %arg1: memref<1xi32, #tpu.memory_space<smem>>, %arg2: memref<16x128xf32, #tpu.memory_space<vmem>>, %arg3: memref<16x128xf32, #tpu.memory_space<vmem>>) attributes {dimension_semantics = [#tpu.dimension_semantics<parallel>], iteration_bounds = array<i64: 1>, scalar_prefetch = 1 : i64, scratch_operands = 0 : i64, tpu.core_type = #tpu.core_type<tc>, window_params = [{transform_indices = @transform_0, window_bounds = array<i64: 16, 128>}, {transform_indices = @transform_1, window_bounds = array<i64: 16, 128>}]} {
    %0 = tpu.iota {dimensions = array<i32: 0>} : vector<8x128xi32>
    %1 = tpu.iota {dimensions = array<i32: 1>} : vector<8x128xi32>
    %c1024_i32 = arith.constant 1024 : i32
    %2 = arith.muli %arg0, %c1024_i32 : i32
    %c128_i32 = arith.constant 128 : i32
    %3 = vector.broadcast %c128_i32 : i32 to vector<8x128xi32>
    %4 = arith.muli %0, %3 : vector<8x128xi32>
    %5 = vector.broadcast %2 : i32 to vector<8x128xi32>
    %6 = arith.addi %5, %4 : vector<8x128xi32>
    %7 = arith.addi %6, %1 : vector<8x128xi32>
    %c0 = arith.constant 0 : index
    %8 = memref.load %arg1[%c0] : memref<1xi32, #tpu.memory_space<smem>>
    %c-1640531527_i32 = arith.constant -1640531527 : i32
    %9 = vector.broadcast %c-1640531527_i32 : i32 to vector<8x128xi32>
    %10 = arith.muli %7, %9 : vector<8x128xi32>
    %11 = vector.broadcast %8 : i32 to vector<8x128xi32>
    %12 = arith.addi %10, %11 : vector<8x128xi32>
    %c1759714724_i32 = arith.constant 1759714724 : i32
    %13 = vector.broadcast %c1759714724_i32 : i32 to vector<8x128xi32>
    %14 = arith.xori %12, %13 : vector<8x128xi32>
    %c16_i32 = arith.constant 16 : i32
    %15 = vector.broadcast %c16_i32 : i32 to vector<8x128xi32>
    %16 = arith.shrsi %14, %15 : vector<8x128xi32>
    %c65535_i32 = arith.constant 65535 : i32
    %17 = vector.broadcast %c65535_i32 : i32 to vector<8x128xi32>
    %18 = arith.andi %16, %17 : vector<8x128xi32>
    %19 = arith.xori %14, %18 : vector<8x128xi32>
    %c-2048144789_i32 = arith.constant -2048144789 : i32
    %20 = vector.broadcast %c-2048144789_i32 : i32 to vector<8x128xi32>
    %21 = arith.muli %19, %20 : vector<8x128xi32>
    %c13_i32 = arith.constant 13 : i32
    %22 = vector.broadcast %c13_i32 : i32 to vector<8x128xi32>
    %23 = arith.shrsi %21, %22 : vector<8x128xi32>
    %c524287_i32 = arith.constant 524287 : i32
    %24 = vector.broadcast %c524287_i32 : i32 to vector<8x128xi32>
    %25 = arith.andi %23, %24 : vector<8x128xi32>
    %26 = arith.xori %21, %25 : vector<8x128xi32>
    %c-1028477387_i32 = arith.constant -1028477387 : i32
    %27 = vector.broadcast %c-1028477387_i32 : i32 to vector<8x128xi32>
    %28 = arith.muli %26, %27 : vector<8x128xi32>
    %c16_i32_0 = arith.constant 16 : i32
    %29 = vector.broadcast %c16_i32_0 : i32 to vector<8x128xi32>
    %30 = arith.shrsi %28, %29 : vector<8x128xi32>
    %c65535_i32_1 = arith.constant 65535 : i32
    %31 = vector.broadcast %c65535_i32_1 : i32 to vector<8x128xi32>
    %32 = arith.andi %30, %31 : vector<8x128xi32>
    %33 = arith.xori %28, %32 : vector<8x128xi32>
    %c-1255572915_i32 = arith.constant -1255572915 : i32
    %34 = vector.broadcast %c-1255572915_i32 : i32 to vector<8x128xi32>
    %35 = arith.xori %12, %34 : vector<8x128xi32>
    %c16_i32_2 = arith.constant 16 : i32
    %36 = vector.broadcast %c16_i32_2 : i32 to vector<8x128xi32>
    %37 = arith.shrsi %35, %36 : vector<8x128xi32>
    %c65535_i32_3 = arith.constant 65535 : i32
    %38 = vector.broadcast %c65535_i32_3 : i32 to vector<8x128xi32>
    %39 = arith.andi %37, %38 : vector<8x128xi32>
    %40 = arith.xori %35, %39 : vector<8x128xi32>
    %c-2048144789_i32_4 = arith.constant -2048144789 : i32
    %41 = vector.broadcast %c-2048144789_i32_4 : i32 to vector<8x128xi32>
    %42 = arith.muli %40, %41 : vector<8x128xi32>
    %c13_i32_5 = arith.constant 13 : i32
    %43 = vector.broadcast %c13_i32_5 : i32 to vector<8x128xi32>
    %44 = arith.shrsi %42, %43 : vector<8x128xi32>
    %c524287_i32_6 = arith.constant 524287 : i32
    %45 = vector.broadcast %c524287_i32_6 : i32 to vector<8x128xi32>
    %46 = arith.andi %44, %45 : vector<8x128xi32>
    %47 = arith.xori %42, %46 : vector<8x128xi32>
    %c-1028477387_i32_7 = arith.constant -1028477387 : i32
    %48 = vector.broadcast %c-1028477387_i32_7 : i32 to vector<8x128xi32>
    %49 = arith.muli %47, %48 : vector<8x128xi32>
    %c16_i32_8 = arith.constant 16 : i32
    %50 = vector.broadcast %c16_i32_8 : i32 to vector<8x128xi32>
    %51 = arith.shrsi %49, %50 : vector<8x128xi32>
    %c65535_i32_9 = arith.constant 65535 : i32
    %52 = vector.broadcast %c65535_i32_9 : i32 to vector<8x128xi32>
    %53 = arith.andi %51, %52 : vector<8x128xi32>
    %54 = arith.xori %49, %53 : vector<8x128xi32>
    %c8_i32 = arith.constant 8 : i32
    %55 = vector.broadcast %c8_i32 : i32 to vector<8x128xi32>
    %56 = arith.shrsi %33, %55 : vector<8x128xi32>
    %c16777215_i32 = arith.constant 16777215 : i32
    %57 = vector.broadcast %c16777215_i32 : i32 to vector<8x128xi32>
    %58 = arith.andi %56, %57 : vector<8x128xi32>
    %59 = arith.sitofp %58 : vector<8x128xi32> to vector<8x128xf32>
    %cst = arith.constant 1.000000e+00 : f32
    %60 = vector.broadcast %cst : f32 to vector<8x128xf32>
    %61 = arith.addf %59, %60 : vector<8x128xf32>
    %cst_10 = arith.constant 5.96046448E-8 : f32
    %62 = vector.broadcast %cst_10 : f32 to vector<8x128xf32>
    %63 = arith.mulf %61, %62 : vector<8x128xf32>
    %c8_i32_11 = arith.constant 8 : i32
    %64 = vector.broadcast %c8_i32_11 : i32 to vector<8x128xi32>
    %65 = arith.shrsi %54, %64 : vector<8x128xi32>
    %c16777215_i32_12 = arith.constant 16777215 : i32
    %66 = vector.broadcast %c16777215_i32_12 : i32 to vector<8x128xi32>
    %67 = arith.andi %65, %66 : vector<8x128xi32>
    %68 = arith.sitofp %67 : vector<8x128xi32> to vector<8x128xf32>
    %cst_13 = arith.constant 5.96046448E-8 : f32
    %69 = vector.broadcast %cst_13 : f32 to vector<8x128xf32>
    %70 = arith.mulf %68, %69 : vector<8x128xf32>
    %71 = math.log %63 : vector<8x128xf32>
    %cst_14 = arith.constant -2.000000e+00 : f32
    %72 = vector.broadcast %cst_14 : f32 to vector<8x128xf32>
    %73 = arith.mulf %72, %71 : vector<8x128xf32>
    %74 = math.sqrt %73 : vector<8x128xf32>
    %cst_15 = arith.constant 5.000000e-01 : f32
    %75 = vector.broadcast %cst_15 : f32 to vector<8x128xf32>
    %76 = arith.cmpf oge, %70, %75 : vector<8x128xf32>
    %cst_16 = arith.constant 1.000000e+00 : f32
    %77 = vector.broadcast %cst_16 : f32 to vector<8x128xf32>
    %78 = arith.subf %70, %77 : vector<8x128xf32>
    %79 = arith.select %76, %78, %70 : vector<8x128xi1>, vector<8x128xf32>
    %cst_17 = arith.constant 2.500000e-01 : f32
    %80 = vector.broadcast %cst_17 : f32 to vector<8x128xf32>
    %81 = arith.subf %70, %80 : vector<8x128xf32>
    %cst_18 = arith.constant 5.000000e-01 : f32
    %82 = vector.broadcast %cst_18 : f32 to vector<8x128xf32>
    %83 = arith.cmpf oge, %81, %82 : vector<8x128xf32>
    %cst_19 = arith.constant 1.000000e+00 : f32
    %84 = vector.broadcast %cst_19 : f32 to vector<8x128xf32>
    %85 = arith.subf %81, %84 : vector<8x128xf32>
    %86 = arith.select %83, %85, %81 : vector<8x128xi1>, vector<8x128xf32>
    %cst_20 = arith.constant 6.28318548 : f32
    %87 = vector.broadcast %cst_20 : f32 to vector<8x128xf32>
    %88 = arith.mulf %87, %79 : vector<8x128xf32>
    %89 = arith.mulf %88, %88 : vector<8x128xf32>
    %cst_21 = arith.constant -1.14707454E-11 : f32
    %90 = vector.broadcast %cst_21 : f32 to vector<8x128xf32>
    %91 = arith.mulf %90, %89 : vector<8x128xf32>
    %cst_22 = arith.constant 2.08767559E-9 : f32
    %92 = vector.broadcast %cst_22 : f32 to vector<8x128xf32>
    %93 = arith.addf %91, %92 : vector<8x128xf32>
    %94 = arith.mulf %93, %89 : vector<8x128xf32>
    %cst_23 = arith.constant -2.755732E-7 : f32
    %95 = vector.broadcast %cst_23 : f32 to vector<8x128xf32>
    %96 = arith.addf %94, %95 : vector<8x128xf32>
    %97 = arith.mulf %96, %89 : vector<8x128xf32>
    %cst_24 = arith.constant 2.48015876E-5 : f32
    %98 = vector.broadcast %cst_24 : f32 to vector<8x128xf32>
    %99 = arith.addf %97, %98 : vector<8x128xf32>
    %100 = arith.mulf %99, %89 : vector<8x128xf32>
    %cst_25 = arith.constant -0.00138888892 : f32
    %101 = vector.broadcast %cst_25 : f32 to vector<8x128xf32>
    %102 = arith.addf %100, %101 : vector<8x128xf32>
    %103 = arith.mulf %102, %89 : vector<8x128xf32>
    %cst_26 = arith.constant 0.0416666679 : f32
    %104 = vector.broadcast %cst_26 : f32 to vector<8x128xf32>
    %105 = arith.addf %103, %104 : vector<8x128xf32>
    %106 = arith.mulf %105, %89 : vector<8x128xf32>
    %cst_27 = arith.constant -5.000000e-01 : f32
    %107 = vector.broadcast %cst_27 : f32 to vector<8x128xf32>
    %108 = arith.addf %106, %107 : vector<8x128xf32>
    %109 = arith.mulf %108, %89 : vector<8x128xf32>
    %cst_28 = arith.constant 1.000000e+00 : f32
    %110 = vector.broadcast %cst_28 : f32 to vector<8x128xf32>
    %111 = arith.addf %109, %110 : vector<8x128xf32>
    %112 = arith.mulf %74, %111 : vector<8x128xf32>
    %cst_29 = arith.constant 6.28318548 : f32
    %113 = vector.broadcast %cst_29 : f32 to vector<8x128xf32>
    %114 = arith.mulf %113, %86 : vector<8x128xf32>
    %115 = arith.mulf %114, %114 : vector<8x128xf32>
    %cst_30 = arith.constant -1.14707454E-11 : f32
    %116 = vector.broadcast %cst_30 : f32 to vector<8x128xf32>
    %117 = arith.mulf %116, %115 : vector<8x128xf32>
    %cst_31 = arith.constant 2.08767559E-9 : f32
    %118 = vector.broadcast %cst_31 : f32 to vector<8x128xf32>
    %119 = arith.addf %117, %118 : vector<8x128xf32>
    %120 = arith.mulf %119, %115 : vector<8x128xf32>
    %cst_32 = arith.constant -2.755732E-7 : f32
    %121 = vector.broadcast %cst_32 : f32 to vector<8x128xf32>
    %122 = arith.addf %120, %121 : vector<8x128xf32>
    %123 = arith.mulf %122, %115 : vector<8x128xf32>
    %cst_33 = arith.constant 2.48015876E-5 : f32
    %124 = vector.broadcast %cst_33 : f32 to vector<8x128xf32>
    %125 = arith.addf %123, %124 : vector<8x128xf32>
    %126 = arith.mulf %125, %115 : vector<8x128xf32>
    %cst_34 = arith.constant -0.00138888892 : f32
    %127 = vector.broadcast %cst_34 : f32 to vector<8x128xf32>
    %128 = arith.addf %126, %127 : vector<8x128xf32>
    %129 = arith.mulf %128, %115 : vector<8x128xf32>
    %cst_35 = arith.constant 0.0416666679 : f32
    %130 = vector.broadcast %cst_35 : f32 to vector<8x128xf32>
    %131 = arith.addf %129, %130 : vector<8x128xf32>
    %132 = arith.mulf %131, %115 : vector<8x128xf32>
    %cst_36 = arith.constant -5.000000e-01 : f32
    %133 = vector.broadcast %cst_36 : f32 to vector<8x128xf32>
    %134 = arith.addf %132, %133 : vector<8x128xf32>
    %135 = arith.mulf %134, %115 : vector<8x128xf32>
    %cst_37 = arith.constant 1.000000e+00 : f32
    %136 = vector.broadcast %cst_37 : f32 to vector<8x128xf32>
    %137 = arith.addf %135, %136 : vector<8x128xf32>
    %138 = arith.mulf %74, %137 : vector<8x128xf32>
    %c0_38 = arith.constant 0 : index
    %c0_39 = arith.constant 0 : index
    %139 = vector.load %arg2[%c0_38, %c0_39] : memref<16x128xf32, #tpu.memory_space<vmem>>, vector<8x128xf32>
    %cst_40 = arith.constant 1.000000e-01 : f32
    %140 = vector.broadcast %cst_40 : f32 to vector<8x128xf32>
    %141 = arith.mulf %112, %140 : vector<8x128xf32>
    %142 = arith.addf %139, %141 : vector<8x128xf32>
    %c0_41 = arith.constant 0 : index
    %c0_42 = arith.constant 0 : index
    %143 = vector.load %arg3[%c0_41, %c0_42] : memref<16x128xf32, #tpu.memory_space<vmem>>, vector<8x128xf32>
    tpu.vector_store %arg3[%c0_41, %c0_42], %142 {strides = array<i32>} : memref<16x128xf32, #tpu.memory_space<vmem>>, vector<8x128xf32>,
    %c8 = arith.constant 8 : index
    %c0_43 = arith.constant 0 : index
    %144 = vector.load %arg2[%c8, %c0_43] : memref<16x128xf32, #tpu.memory_space<vmem>>, vector<8x128xf32>
    %cst_44 = arith.constant 1.000000e-01 : f32
    %145 = vector.broadcast %cst_44 : f32 to vector<8x128xf32>
    %146 = arith.mulf %138, %145 : vector<8x128xf32>
    %147 = arith.addf %144, %146 : vector<8x128xf32>
    %c8_45 = arith.constant 8 : index
    %c0_46 = arith.constant 0 : index
    %148 = vector.load %arg3[%c8_45, %c0_46] : memref<16x128xf32, #tpu.memory_space<vmem>>, vector<8x128xf32>
    tpu.vector_store %arg3[%c8_45, %c0_46], %147 {strides = array<i32>} : memref<16x128xf32, #tpu.memory_space<vmem>>, vector<8x128xf32>,
    return
  }
  func.func @transform_0(%arg0: i32, %arg1: memref<1xi32, #tpu.memory_space<smem>>) -> (i32, i32) {
    %c0_i32 = arith.constant 0 : i32
    %c0_i32_0 = arith.constant 0 : i32
    return %arg0, %c0_i32 : i32, i32
  }
  func.func @transform_1(%arg0: i32, %arg1: memref<1xi32, #tpu.memory_space<smem>>) -> (i32, i32) {
    %c0_i32 = arith.constant 0 : i32
    %c0_i32_0 = arith.constant 0 : i32
    return %arg0, %c0_i32 : i32, i32
  }
}

</mosaic_0001>

<bundles_post_ra>
// kernel: tpu_custom_call.1
= control target key start
LH: loop header
LB: loop body
LE: loop exit
PB: predicated region body
PF: predicated region fallthrough
CT: control target
= control target key end

     0   :  { %8 = vsyncpa [#allocation5], 0  ;;  %s266_s0 = inlined_call_operand.<no memory space> [shape: s32[1], index: 0, kind: input, shape index: {}]   ;;  %s267_s1 = inlined_call_operand.hbm [shape: f32[16,128], index: 1, kind: input, shape index: {}]   ;;  %s268_s2 = inlined_call_operand.hbm [shape: f32[16,128], index: 2, kind: output, shape index: {}]  }
   0x1   :  { %9 = vsyncpa [#allocation6], 0  ;;  %s214_s9 = smov [#allocation4]   ;;  %s166_s13 = scalar_lea.hbm %s267_s1, 256 }
   0x2   :  { %s15_s10 = sshll.u32 %s214_s9, 4  ;;  %p167_p0 = scmp.ne.s32.totalorder %s267_s1, %s166_s13  ;;  %s16_s10 = int_to_ptr.vmem [resolvable:$true] %s15_s10 }
   0x3   :  { %p170_p1 = scmp.lt.u32.totalorder %s166_s13, %s267_s1 }
   0x5   :  { %p172_p2 = pnand %p170_p1, %p167_p0 }
   0x7   :  { %175 = shalt.err (!%p172_p2)
}
   0x8   :  { %s176_s18 = scalar_lea.vmem %s16_s10, 256  ;;  %p181_p4 = scmp.lt.s32.totalorder %s16_s10, %s16_s10 }
   0x9   :  { %p177_p3 = scmp.ne.s32.totalorder %s16_s10, %s176_s18  ;;  %p182_p5 = scmp.lt.s32.totalorder %s176_s18, %s176_s18 }
   0xb   :  { %p183_p6 = por %p182_p5, %p181_p4 }
   0xd   :  { %p184_p7 = pnand %p183_p6, %p177_p3 }
   0xf   :  { %187 = shalt.err (!%p184_p7)
}
  0x10   :  { %s215_s19 = smov 128   ;;  %s216_s20 = smov 8  }
  0x11   :  { %21 = dma.hbm_to_vmem [thread:$0]  %s267_s1, 256, %s16_s10, [#allocation5], %s215_s19, %s215_s19, %s216_s20  }
  0x12   :  { %210 = dma.done.wait [#allocation5], 256  }
  0x13   :  { %211 = vsyncadd [#allocation5], 4294967040  ;;  %v25_v0 = vlaneseq  ;;  %v36_v5 = vstv %s266_s0  ;;  %s217_s0 = smov [#allocation7]  }
  0x14   :  { %s135_s1 = sshll.u32 %s217_s0, 4  ;;  %s136_s1 = int_to_ptr.vmem [resolvable:$true] %s135_s1 }
  0x15   :  { %v26_v1 = vshrl.u32 %v25_v0, 7  ;;  %v28_v2 = vand.u32 127, %v25_v0  ;;  %s188_s25 = scalar_lea.vmem %s136_s1, 256  ;;  %p193_p9 = scmp.lt.s32.totalorder %s136_s1, %s136_s1 }
  0x16   :  { %p189_p8 = scmp.ne.s32.totalorder %s136_s1, %s188_s25  ;;  %p194_p10 = scmp.lt.s32.totalorder %s188_s25, %s188_s25 }
  0x17   :  { %v30_v3 = vmul.u32 128, %v26_v1 }
  0x18   :  { %p195_p11 = por %p194_p10, %p193_p9 }
  0x19   :  { %v33_v4 = vadd.s32 %v30_v3, %v28_v2 }
  0x1a   :  { %p196_p12 = pnand %p195_p11, %p189_p8 }
  0x1b   :  { %v35_v6 = vmul.u32 2654435769, %v33_v4 }
  0x1d   :  { %v37_v7 = vadd.s32 %v36_v5, %v35_v6 }
  0x1f   :  { %v38_v8 = vxor.u32 1759714724, %v37_v7  ;;  %v50_v9 = vxor.u32 3039394381, %v37_v7 }
  0x21   :  { %v147_v10 = vshrl.u32 %v38_v8, 16  ;;  %v150_v11 = vshrl.u32 %v50_v9, 16 }
  0x23   :  { %v41_v12 = vxor.u32 %v147_v10, %v38_v8  ;;  %v53_v13 = vxor.u32 %v150_v11, %v50_v9 }
  0x25   :  { %v42_v14 = vmul.u32 2246822507, %v41_v12  ;;  %v54_v15 = vmul.u32 2246822507, %v53_v13 }
  0x27   :  { %v148_v16 = vshrl.u32 %v42_v14, 13  ;;  %v151_v17 = vshrl.u32 %v54_v15, 13 }
  0x29   :  { %v45_v18 = vxor.u32 %v148_v16, %v42_v14  ;;  %v57_v19 = vxor.u32 %v151_v17, %v54_v15  ;;  %v122_v15 = vld [vmem:[#allocation4] sm:$0xff] }
  0x2b   :  { %v46_v20 = vmul.u32 3266489909, %v45_v18  ;;  %v58_v21 = vmul.u32 3266489909, %v57_v19  ;;  %v126_v18 = vld [vmem:[#allocation4 + $0x8] sm:$0xff] }
  0x2d   :  { %v149_v22 = vshrl.u32 %v46_v20, 16  ;;  %v152_v23 = vshrl.u32 %v58_v21, 16 }
  0x2f   :  { %v49_v24 = vxor.u32 %v149_v22, %v46_v20  ;;  %v61_v25 = vxor.u32 %v152_v23, %v58_v21 }
  0x31   :  { %v153_v26 = vshrl.u32 %v49_v24, 8  ;;  %v154_v27 = vshrl.u32 %v61_v25, 8 }
  0x33   :  { %v64_v28 = vcvt.s32.f32 %v153_v26  ;;  %v69_v29 = vcvt.s32.f32 %v154_v27 }
  0x35   :  { %v65_v30 = vadd.f32 1.0, %v64_v28  ;;  %v70_v31 = vmul.f32 5.9604645e-08, %v69_v29 }
  0x37   :  { %v66_v32 = vmul.f32 5.9604645e-08, %v65_v30  ;;  %vm81_vm0 = vcmp.ge.f32.partialorder %v70_v31, 0.5  ;;  %v155_v33 = vadd.f32 -1.0, %v70_v31  ;;  %v156_v34 = vadd.f32 -0.25, %v70_v31 }
  0x39   :  { %162 = vlog2.f32 %v66_v32  ;;  %v83_v35 = vsel %vm81_vm0, %v155_v33, %v70_v31  ;;  %vm85_vm1 = vcmp.ge.f32.partialorder %v156_v34, 0.5  ;;  %v157_v36 = vadd.f32 -1.0, %v156_v34 }
  0x3a   :  { %v88_v37 = vmul.f32 6.2831855, %v83_v35 }
  0x3b   :  { %v87_v38 = vsel %vm85_vm1, %v157_v36, %v156_v34 }
  0x3c   :  { %v89_v39 = vmul.f32 %v88_v37, %v88_v37  ;;  %v105_v40 = vmul.f32 6.2831855, %v87_v38 }
  0x3e   :  { %v90_v41 = vmul.f32 -1.1470745e-11, %v89_v39  ;;  %v106_v42 = vmul.f32 %v105_v40, %v105_v40 }
  0x40   :  { %v91_v43 = vadd.f32 2.0876756e-09, %v90_v41  ;;  %v107_v44 = vmul.f32 -1.1470745e-11, %v106_v42 }
  0x42   :  { %v92_v45 = vmul.f32 %v91_v43, %v89_v39  ;;  %v108_v46 = vadd.f32 2.0876756e-09, %v107_v44 }
  0x43   :  { %v163_v47 = vpop.eup %162 }
  0x44   :  { %v72_v48 = vmul.f32 0.6931472, %v163_v47  ;;  %v93_v49 = vadd.f32 -2.755732e-07, %v92_v45  ;;  %v109_v50 = vmul.f32 %v108_v46, %v106_v42 }
  0x46   :  { %v73_v51 = vmul.f32 -2.0, %v72_v48  ;;  %v94_v52 = vmul.f32 %v93_v49, %v89_v39  ;;  %v110_v53 = vadd.f32 -2.755732e-07, %v109_v50 }
  0x48   :  { %164 = vrsqrt.f32 %v73_v51  ;;  %v95_v54 = vadd.f32 2.4801588e-05, %v94_v52  ;;  %v111_v55 = vmul.f32 %v110_v53, %v106_v42  ;;  %vm76_vm2 = vcmp.eq.f32.partialorder %v73_v51, inf }
  0x49   :  { %v79_v4 = vand.u32 2147483648, %v73_v51  ;;  %vm78_vm3 = vcmp.eq.f32.partialorder %v73_v51, 0.0 }
  0x4a   :  { %v96_v56 = vmul.f32 %v95_v54, %v89_v39  ;;  %v112_v57 = vadd.f32 2.4801588e-05, %v111_v55 }
  0x4c   :  { %v97_v58 = vadd.f32 -0.0013888889, %v96_v56  ;;  %v113_v59 = vmul.f32 %v112_v57, %v106_v42 }
  0x4e   :  { %v98_v60 = vmul.f32 %v97_v58, %v89_v39  ;;  %v114_v61 = vadd.f32 -0.0013888889, %v113_v59 }
  0x50   :  { %v99_v62 = vadd.f32 0.041666668, %v98_v60  ;;  %v115_v63 = vmul.f32 %v114_v61, %v106_v42 }
  0x52   :  { %v165_v0 = vpop.eup %164  ;;  %v100_v2 = vmul.f32 %v99_v62, %v89_v39  ;;  %v116_v3 = vadd.f32 0.041666668, %v115_v63 }
  0x53   :  { %v75_v1 = vmul.f32 %v165_v0, %v73_v51 }
  0x54   :  { %v101_v6 = vadd.f32 -0.5, %v100_v2  ;;  %v117_v7 = vmul.f32 %v116_v3, %v106_v42 }
  0x55   :  { %v77_v5 = vsel %vm76_vm2, %v73_v51, %v75_v1 }
  0x56   :  { %v102_v8 = vmul.f32 %v101_v6, %v89_v39  ;;  %v118_v9 = vadd.f32 -0.5, %v117_v7  ;;  %v80_v10 = vsel %vm78_vm3, %v79_v4, %v77_v5 }
  0x58   :  { %v103_v11 = vadd.f32 1.0, %v102_v8  ;;  %v119_v12 = vmul.f32 %v118_v9, %v106_v42 }
  0x5a   :  { %v104_v13 = vmul.f32 %v103_v11, %v80_v10  ;;  %v120_v14 = vadd.f32 1.0, %v119_v12 }
  0x5c   :  { %v123_v16 = vmul.f32 0.1, %v104_v13  ;;  %v121_v17 = vmul.f32 %v120_v14, %v80_v10 }
  0x5e   :  { %v124_v19 = vadd.f32 %v123_v16, %v122_v15  ;;  %v127_v20 = vmul.f32 0.1, %v121_v17 }
  0x60   :  { %125 = vst [vmem:[#allocation7] sm:$0xff] %v124_v19  ;;  %v128_v21 = vadd.f32 %v127_v20, %v126_v18 }
  0x62   :  { %129 = vst [vmem:[#allocation7 + $0x8] sm:$0xff] %v128_v21 }
  0x63   :  { %199 = shalt.err (!%p196_p12)
}
  0x64   :  { %s200_s28 = scalar_lea.hbm %s268_s2, 256 }
  0x65   :  { %p201_p13 = scmp.ne.s32.totalorder %s268_s2, %s200_s28  ;;  %p204_p0 = scmp.lt.u32.totalorder %s200_s28, %s268_s2 }
  0x67   :  { %p206_p1 = pnand %p204_p0, %p201_p13 }
  0x69   :  { %209 = shalt.err (!%p206_p1)
}
  0x6a   :  { %141 = dma.vmem_to_hbm [thread:$0]  %s136_s1, 256, %s268_s2, [#allocation6], %s215_s19, %s215_s19, %s216_s20  }
  0x6b   :  { %212 = dma.done.wait [#allocation6], 256  }
  0x6c   :  { %213 = vsyncadd [#allocation6], 4294967040 }
  0x6d   :  { %145 = vsyncpa [#allocation5], 1 }
  0x6e   :  { %146 = vsyncpa [#allocation6], 1 }

</bundles_post_ra>
